<compile_context>
chip_gen: v6e
topology: v6e:2x2x1
jax: 0.10.0
libtpu: 0.0.40
codegen_flags: <defaults>
</compile_context>

<pallas_src>
import jax
import jax.numpy as jnp
from jax.experimental import pallas as pl
from jax.experimental.pallas import tpu as pltpu

_MiB = 1024 * 1024


def _round_up(x, m):
    return ((x + m - 1) // m) * m


def _vmem_capacity_bytes():
    """Physical VMEM per TensorCore; conservative fallback (v7x-sized) if unknown."""
    try:
        info = pltpu.get_tpu_info()
        cap = getattr(info, "vmem_capacity_bytes", None)
        if cap:
            return int(cap)
    except Exception:
        pass
    return 64 * _MiB


# --------------------------- kernels ---------------------------

def _linrelu_kernel_acc(x_ref, w_ref, b_ref, o_ref, acc_ref):
    """General path: f32 VMEM accumulator; epilogue adds bias, ReLUs, casts."""
    k = pl.program_id(2)

    @pl.when(k == 0)
    def _():
        acc_ref[...] = jnp.zeros_like(acc_ref)

    acc_ref[...] += jnp.dot(x_ref[...], w_ref[...],
                            preferred_element_type=jnp.float32)

    @pl.when(k == pl.num_programs(2) - 1)
    def _():
        o_ref[...] = jnp.maximum(acc_ref[...] + b_ref[...], 0.0).astype(o_ref.dtype)


def _linrelu_kernel_f32out(x_ref, w_ref, b_ref, o_ref):
    """f32-output path: accumulate directly into the resident output block
    (saves a (tm,tn) f32 scratch buffer and the epilogue copy)."""
    k = pl.program_id(2)

    @pl.when(k == 0)
    def _():
        o_ref[...] = jnp.zeros_like(o_ref)

    o_ref[...] += jnp.dot(x_ref[...], w_ref[...],
                          preferred_element_type=jnp.float32)

    @pl.when(k == pl.num_programs(2) - 1)
    def _():
        o_ref[...] = jnp.maximum(o_ref[...] + b_ref[...], 0.0)


# --------------------------- module-style wrapper ---------------------------

class LinReLU:
    """Pallas-TPU LinReLU (y = relu(x @ W^T + b)) with one-time weight prep.

    weight: [out_size, in_size] (PyTorch nn.Linear layout), bias: [out_size].
    compute_dtype: optionally stream weights/activations in e.g. bf16
    (f32 accumulation is always used); None keeps exact input-dtype math.
    """

    def __init__(self, weight, bias, *, compute_dtype=None, batch_hint=128,
                 tm=None, tn=None, tk=None, weight_buffers=2):
        out_size, in_size = weight.shape
        assert bias.shape == (out_size,), "bias must be [out_size]"
        self.in_size, self.out_size = in_size, out_size
        self.weight_buffers = int(weight_buffers)

        cd = jnp.dtype(compute_dtype) if compute_dtype is not None else jnp.dtype(weight.dtype)
        self.compute_dtype = cd
        ci = cd.itemsize
        # Packed-dtype native sublane tile: 8 rows (f32), 16 (bf16), 32 (int8/fp8).
        self.m_align = {4: 8, 2: 16, 1: 32}.get(ci, 8)

        n_p = _round_up(out_size, 128)
        k_p = _round_up(in_size, 128)
        m_hint = _round_up(max(1, int(batch_hint)), self.m_align)

        # ---- default tile selection: big tiles; GEMV regime grows N/K not M.
        small_batch = m_hint <= 128
        tn_given = tn is not None
        tm_cap = tm if tm is not None else min(512, m_hint)
        if tn is None:
            tn = min(1024 if small_batch else 512, n_p)
        if tk is None:
            tk = min(2048 if small_batch else 1024, k_p)

        # v7x has 2 TensorCores; if the batch fits a single i block, expose >= 2
        # j blocks so both cores get "parallel" work (skinny-but-wide layers).
        if (not tn_given) and m_hint <= tm_cap and n_p >= 256 and pl.cdiv(n_p, tn) < 2:
            tn = _round_up(max(128, n_p // 2), 128)

        # ---- chip-gated VMEM budget (v7x: 64 MiB physical -> ~48 MiB budget;
        # v5e/v6e: 128 MiB -> up to ~100 MiB). Shrink tiles until they fit.
        vmem_cap = _vmem_capacity_bytes()
        budget = max(16 * _MiB, min(vmem_cap - 16 * _MiB, 100 * _MiB))

        def _footprint(tm_, tn_, tk_):
            # double-buffered inputs + double-buffered output + f32 acc (worst case)
            return (2 * tm_ * tk_ * ci + 2 * tk_ * tn_ * ci + 2 * tn_ * 4
                    + 2 * tm_ * tn_ * 4 + tm_ * tn_ * 4)

        while _footprint(tm_cap, tn, tk) > budget:
            if tk >= max(tn, tm_cap) and tk > 128:
                tk = max(128, (tk // 2 // 128) * 128)
            elif tn >= tm_cap and tn > 128:
                tn = max(128, (tn // 2 // 128) * 128)
            elif tm_cap > self.m_align:
                tm_cap = max(self.m_align, (tm_cap // 2 // self.m_align) * self.m_align)
            else:
                break

        self.tm_cap, self.tn, self.tk = tm_cap, tn, tk
        self.n_p = _round_up(n_p, tn)
        self.k_p = _round_up(k_p, tk)
        self.vmem_limit = int(min(max(2 * _footprint(tm_cap, tn, tk), 32 * _MiB),
                                  max(32 * _MiB, vmem_cap * 3 // 4)))

        # ---- one-time weight/bias prep (cast + transpose + pad), cached in HBM.
        w = weight.astype(cd).T  # [in_size, out_size]: MXU-native (tk, tn) tiles
        self.w_p = jnp.pad(w, ((0, self.k_p - in_size), (0, self.n_p - out_size)))
        self.b_p = jnp.pad(bias.astype(jnp.float32),
                           (0, self.n_p - out_size)).reshape(1, self.n_p)

    def __call__(self, x):
        B, in_size = x.shape
        assert in_size == self.in_size, "x must be [B, in_size]"
        out_dtype = x.dtype

        xc = x.astype(self.compute_dtype) if jnp.dtype(x.dtype) != self.compute_dtype else x

        m_p = _round_up(B, self.m_align)
        tm = min(self.tm_cap, m_p)
        m_p = _round_up(m_p, tm)
        # Only K padding matters for correctness of the dot; M padding is kept
        # so block shapes stay sublane-aligned (the extra rows are sliced off).
        x_p = jnp.pad(xc, ((0, m_p - B), (0, self.k_p - in_size)))

        tn, tk = self.tn, self.tk
        grid = (m_p // tm, self.n_p // tn, self.k_p // tk)
        n_i, n_j = grid[0], grid[1]

        f32_out = jnp.dtype(out_dtype) == jnp.dtype(jnp.float32)
        kernel = _linrelu_kernel_f32out if f32_out else _linrelu_kernel_acc
        scratch = [] if f32_out else [pltpu.VMEM((tm, tn), jnp.float32)]

        # Weight is the dominant DMA stream; optionally deepen its pipeline.
        if self.weight_buffers > 2 and hasattr(pl, "Buffered"):
            w_spec = pl.BlockSpec((tk, tn), lambda i, j, k: (k, j),
                                  pipeline_mode=pl.Buffered(self.weight_buffers))
        else:
            w_spec = pl.BlockSpec((tk, tn), lambda i, j, k: (k, j))

        flops = 2 * m_p * self.n_p * self.k_p
        # Truthful HBM traffic: x is re-read per j block, weight per i block.
        bytes_accessed = (x_p.size * x_p.dtype.itemsize * n_j
                          + self.w_p.size * self.w_p.dtype.itemsize * n_i
                          + self.b_p.size * self.b_p.dtype.itemsize * n_i
                          + m_p * self.n_p * jnp.dtype(out_dtype).itemsize)

        out_p = pl.pallas_call(
            kernel,
            out_shape=jax.ShapeDtypeStruct((m_p, self.n_p), out_dtype),
            grid_spec=pltpu.PrefetchScalarGridSpec(
                num_scalar_prefetch=0,
                grid=grid,
                in_specs=[
                    pl.BlockSpec((tm, tk), lambda i, j, k: (i, k)),   # x tile
                    w_spec,                                           # W^T tile
                    pl.BlockSpec((1, tn), lambda i, j, k: (0, j)),    # bias tile
                ],
                out_specs=pl.BlockSpec((tm, tn), lambda i, j, k: (i, j)),
                scratch_shapes=scratch,
            ),
            compiler_params=pltpu.CompilerParams(
                dimension_semantics=("parallel", "parallel", "arbitrary"),
                vmem_limit_bytes=self.vmem_limit,
            ),
            cost_estimate=pl.CostEstimate(
                flops=flops, transcendentals=0, bytes_accessed=bytes_accessed),
        )(x_p, self.w_p, self.b_p)

        return out_p[:B, :self.out_size]


def lin_relu(x, weight, bias, **kwargs):
    """Functional one-shot wrapper (weight prep NOT cached -- prefer LinReLU
    for repeated calls, where the cast/transpose/pad happens once)."""
    return LinReLU(weight, bias, batch_hint=x.shape[0], **kwargs)(x)


# --------------------------- tests ---------------------------

if __name__ == "__main__":
    key = jax.random.PRNGKey(0)

    # ---- Test 1: small shapes, cached-weight module path (f32 exact). ----
    batch, in_size, out_size = 8, 32, 16
    kx, kw, kb = jax.random.split(key, 3)
    bound = 1.0 / (in_size ** 0.5)  # PyTorch nn.Linear init range
    weight = jax.random.uniform(kw, (out_size, in_size), jnp.float32, -bound, bound)
    bias = jax.random.uniform(kb, (out_size,), jnp.float32, -bound, bound)
    x = jax.random.normal(kx, (batch, in_size), jnp.float32)

    mod = LinReLU(weight, bias, batch_hint=batch)   # one-time weight prep
    out = mod(x)
    jax.block_until_ready(out)
    ref = jnp.maximum(x @ weight.T + bias, 0.0)
    assert out.shape == (batch, out_size)
    assert jnp.allclose(out, ref, atol=1e-5, rtol=1e-5)

    # ---- Test 2: odd shapes + explicit small tiles to exercise the full
    # multi-block (i, j, k) grid, padding and the k-epilogue. ----
    b2, i2, o2 = 24, 300, 200
    k2x, k2w, k2b = jax.random.split(jax.random.PRNGKey(1), 3)
    bound2 = 1.0 / (i2 ** 0.5)
    w2 = jax.random.uniform(k2w, (o2, i2), jnp.float32, -bound2, bound2)
    bi2 = jax.random.uniform(k2b, (o2,), jnp.float32, -bound2, bound2)
    x2 = jax.random.normal(k2x, (b2, i2), jnp.float32)
    ref2 = jnp.maximum(x2 @ w2.T + bi2, 0.0)

    out2 = lin_relu(x2, w2, bi2, tm=8, tn=128, tk=128)
    jax.block_until_ready(out2)
    assert out2.shape == (b2, o2)
    assert jnp.allclose(out2, ref2, atol=1e-4, rtol=1e-4)

    # ---- Test 3: auto-tuned tiles (small-batch regime + 2-TC N split), f32. ----
    out3 = lin_relu(x2, w2, bi2)
    jax.block_until_ready(out3)
    assert jnp.allclose(out3, ref2, atol=1e-4, rtol=1e-4)

    # ---- Test 4: bf16 weight/activation streaming, f32 accumulate + f32 out. ----
    out4 = lin_relu(x2, w2, bi2, compute_dtype=jnp.bfloat16)
    jax.block_until_ready(out4)
    assert jnp.allclose(out4, ref2, atol=2e-2, rtol=2e-2)

    # ---- Test 5: bf16 output (exercises the VMEM-accumulator kernel path). ----
    mod_bf16 = LinReLU(weight, bias, compute_dtype=jnp.bfloat16, batch_hint=batch)
    out5 = mod_bf16(x.astype(jnp.bfloat16))
    jax.block_until_ready(out5)
    assert out5.dtype == jnp.bfloat16
    assert jnp.allclose(out5.astype(jnp.float32), ref, atol=3e-2, rtol=3e-2)

    print("KERNEL_OK")
</pallas_src>

<mosaic_0001>
module attributes {stable_mosaic.version = 11 : i64} {
  func.func @_linrelu_kernel_f32out(%arg0: i32, %arg1: i32, %arg2: i32, %arg3: memref<8x128xf32, #tpu.memory_space<vmem>>, %arg4: memref<128x128xf32, #tpu.memory_space<vmem>>, %arg5: memref<1x128xf32, #tpu.memory_space<vmem>>, %arg6: memref<8x128xf32, #tpu.memory_space<vmem>>) attributes {dimension_semantics = [#tpu.dimension_semantics<parallel>, #tpu.dimension_semantics<parallel>, #tpu.dimension_semantics<arbitrary>], iteration_bounds = array<i64: 1, 1, 1>, scalar_prefetch = 0 : i64, scratch_operands = 0 : i64, tpu.core_type = #tpu.core_type<tc>, window_params = [{transform_indices = @transform_0, window_bounds = array<i64: 8, 128>}, {transform_indices = @transform_1, window_bounds = array<i64: 128, 128>}, {transform_indices = @transform_2, window_bounds = array<i64: 1, 128>}, {transform_indices = @transform_3, window_bounds = array<i64: 8, 128>}]} {
    %c0_i32 = arith.constant 0 : i32
    %0 = arith.cmpi eq, %arg2, %c0_i32 : i32
    %1 = arith.extui %0 : i1 to i32
    %c0_i32_0 = arith.constant 0 : i32
    %2 = arith.cmpi ne, %1, %c0_i32_0 : i32
    scf.if %2 {
      %cst_10 = arith.constant 0.000000e+00 : f32
      %12 = vector.broadcast %cst_10 : f32 to vector<8x128xf32>
      %c0_11 = arith.constant 0 : index
      %c0_12 = arith.constant 0 : index
      %13 = vector.load %arg6[%c0_11, %c0_12] : memref<8x128xf32, #tpu.memory_space<vmem>>, vector<8x128xf32>
      tpu.vector_store %arg6[%c0_11, %c0_12], %12 {strides = array<i32>} : memref<8x128xf32, #tpu.memory_space<vmem>>, vector<8x128xf32>,
    } else {
    }
    %c0 = arith.constant 0 : index
    %c0_1 = arith.constant 0 : index
    %3 = vector.load %arg6[%c0, %c0_1] : memref<8x128xf32, #tpu.memory_space<vmem>>, vector<8x128xf32>
    %c0_2 = arith.constant 0 : index
    %c0_3 = arith.constant 0 : index
    %4 = vector.load %arg3[%c0_2, %c0_3] : memref<8x128xf32, #tpu.memory_space<vmem>>, vector<8x128xf32>
    %c0_4 = arith.constant 0 : index
    %c0_5 = arith.constant 0 : index
    %5 = vector.load %arg4[%c0_4, %c0_5] : memref<128x128xf32, #tpu.memory_space<vmem>>, vector<128x128xf32>
    %cst = arith.constant dense<0.000000e+00> : vector<8x128xf32>
    %6 = tpu.matmul %4, %5, %cst {dimension_numbers = #tpu.dot_dimension_numbers<[1], [0], [0], [1], [0, 0, 1, 1], [], []>} : vector<8x128xf32>, vector<128x128xf32>, vector<8x128xf32> -> vector<8x128xf32>
    %7 = arith.addf %3, %6 : vector<8x128xf32>
    %c0_6 = arith.constant 0 : index
    %c0_7 = arith.constant 0 : index
    %8 = vector.load %arg6[%c0_6, %c0_7] : memref<8x128xf32, #tpu.memory_space<vmem>>, vector<8x128xf32>
    tpu.vector_store %arg6[%c0_6, %c0_7], %7 {strides = array<i32>} : memref<8x128xf32, #tpu.memory_space<vmem>>, vector<8x128xf32>,
    %c0_i32_8 = arith.constant 0 : i32
    %9 = arith.cmpi eq, %arg2, %c0_i32_8 : i32
    %10 = arith.extui %9 : i1 to i32
    %c0_i32_9 = arith.constant 0 : i32
    %11 = arith.cmpi ne, %10, %c0_i32_9 : i32
    scf.if %11 {
      %c0_10 = arith.constant 0 : index
      %c0_11 = arith.constant 0 : index
      %12 = vector.load %arg6[%c0_10, %c0_11] : memref<8x128xf32, #tpu.memory_space<vmem>>, vector<8x128xf32>
      %c0_12 = arith.constant 0 : index
      %c0_13 = arith.constant 0 : index
      %13 = vector.load %arg5[%c0_12, %c0_13] : memref<1x128xf32, #tpu.memory_space<vmem>>, vector<1x128xf32>
      %14 = vector.broadcast %13 : vector<1x128xf32> to vector<8x128xf32>
      %15 = arith.addf %12, %14 : vector<8x128xf32>
      %cst_14 = arith.constant 0.000000e+00 : f32
      %16 = vector.broadcast %cst_14 : f32 to vector<8x128xf32>
      %17 = arith.maximumf %15, %16 : vector<8x128xf32>
      %c0_15 = arith.constant 0 : index
      %c0_16 = arith.constant 0 : index
      %18 = vector.load %arg6[%c0_15, %c0_16] : memref<8x128xf32, #tpu.memory_space<vmem>>, vector<8x128xf32>
      tpu.vector_store %arg6[%c0_15, %c0_16], %17 {strides = array<i32>} : memref<8x128xf32, #tpu.memory_space<vmem>>, vector<8x128xf32>,
    } else {
    }
    return
  }
  func.func @transform_0(%arg0: i32, %arg1: i32, %arg2: i32) -> (i32, i32) {
    %c0_i32 = arith.constant 0 : i32
    return %arg0, %arg2 : i32, i32
  }
  func.func @transform_1(%arg0: i32, %arg1: i32, %arg2: i32) -> (i32, i32) {
    %c0_i32 = arith.constant 0 : i32
    return %arg2, %arg1 : i32, i32
  }
  func.func @transform_2(%arg0: i32, %arg1: i32, %arg2: i32) -> (i32, i32) {
    %c0_i32 = arith.constant 0 : i32
    %c0_i32_0 = arith.constant 0 : i32
    return %c0_i32, %arg1 : i32, i32
  }
  func.func @transform_3(%arg0: i32, %arg1: i32, %arg2: i32) -> (i32, i32) {
    %c0_i32 = arith.constant 0 : i32
    return %arg0, %arg1 : i32, i32
  }
}

</mosaic_0001>

<bundles_post_ra>
// kernel: tpu_custom_call.1
= control target key start
LH: loop header
LB: loop body
LE: loop exit
PB: predicated region body
PF: predicated region fallthrough
CT: control target
= control target key end

     0   :  { %8 = vsyncpa [#allocation3], 0  ;;  %s331_s0 = inlined_call_operand.hbm [shape: f32[8,128], index: 0, kind: input, shape index: {}]   ;;  %s332_s1 = inlined_call_operand.hbm [shape: f32[128,128], index: 1, kind: input, shape index: {}]   ;;  %s333_s2 = inlined_call_operand.vmem [shape: f32[1,128], index: 2, kind: input, shape index: {}]   ;;  %s334_s3 = inlined_call_operand.hbm [shape: f32[8,128], index: 3, kind: output, shape index: {}]  }
   0x1   :  { %9 = vsyncpa [#allocation6], 0 }
   0x2   :  { %10 = vsyncpa [#allocation4], 0  ;;  %s292_s12 = smov [#allocation2]   ;;  %s293_s14 = smov [#allocation5]  }
   0x3   :  { %s17_s13 = sshll.u32 %s292_s12, 4  ;;  %s26_s15 = sshll.u32 %s293_s14, 4  ;;  %s18_s13 = int_to_ptr.vmem [resolvable:$true] %s17_s13  ;;  %s27_s15 = int_to_ptr.vmem [resolvable:$true] %s26_s15 }
   0x4   :  { %s234_s16 = scalar_lea.vmem %s18_s13, 128  ;;  %p239_p1 = scmp.lt.s32.totalorder %s18_s13, %s18_s13 }
   0x5   :  { %p235_p0 = scmp.ne.s32.totalorder %s18_s13, %s234_s16  ;;  %p240_p2 = scmp.lt.s32.totalorder %s234_s16, %s234_s16 }
   0x7   :  { %p241_p3 = por %p240_p2, %p239_p1 }
   0x9   :  { %p242_p4 = pnand %p241_p3, %p235_p0 }
   0xb   :  { %245 = shalt.err (!%p242_p4)
}
   0xc   :  { %20 = dma.hbm_to_vmem [thread:$0]  %s331_s0, 128, %s18_s13, [#allocation3]  }
   0xd   :  { %s254_s19 = scalar_lea.vmem %s27_s15, 2048  ;;  %p259_p6 = scmp.lt.s32.totalorder %s27_s15, %s27_s15 }
   0xe   :  { %p255_p5 = scmp.ne.s32.totalorder %s27_s15, %s254_s19  ;;  %p260_p7 = scmp.lt.s32.totalorder %s254_s19, %s254_s19 }
  0x10   :  { %p261_p8 = por %p260_p7, %p259_p6 }
  0x12   :  { %p262_p9 = pnand %p261_p8, %p255_p5 }
  0x14   :  { %265 = shalt.err (!%p262_p9)
}
  0x15   :  { %s294_s20 = smov 128   ;;  %s295_s21 = smov 8  }
  0x16   :  { %32 = dma.hbm_to_vmem [thread:$0]  %s332_s1, 2048, %s27_s15, [#allocation6], %s294_s20, %s294_s20, %s295_s21  }
  0x17   :  { %286 = dma.done.wait [#allocation3], 128  }
  0x18   :  { %287 = vsyncadd [#allocation3], 4294967168 }
  0x19   :  { %288 = dma.done.wait [#allocation6], 2048  }
  0x1a   :  { %289 = vsyncadd [#allocation6], 4294965248  ;;  %v296_v0 = vmov 0.0   ;;  %vm297_vm0 = vmmov 0   ;;  %v63_v1 = vld [vmem:[#allocation5 + $0x78] sm:$0xff]  ;;  %v62_v2 = vld [vmem:[#allocation5 + $0x70] sm:$0xff] }
  0x1b   :  { %184 = vmatprep.subr.mxu0 %v296_v0  ;;  %216 = vmatprep.mubr.msk.f32.mxu0 %vm297_vm0, %v296_v0  ;;  %v61_v3 = vld [vmem:[#allocation5 + $0x68] sm:$0xff]  ;;  %v60_v4 = vld [vmem:[#allocation5 + $0x60] sm:$0xff]  ;;  %v59_v5 = vld [vmem:[#allocation5 + $0x58] sm:$0xff]  ;;  %s298_s24 = smov [#allocation7]  }
  0x1c   :  { %185 = vmatpush3.msra.mxu0 %v63_v1  ;;  %v58_v6 = vld [vmem:[#allocation5 + $0x50] sm:$0xff]  ;;  %v57_v7 = vld [vmem:[#allocation5 + $0x48] sm:$0xff]  ;;  %v56_v8 = vld [vmem:[#allocation5 + $0x40] sm:$0xff]  ;;  %s156_s25 = sshll.u32 %s298_s24, 4  ;;  %s157_s25 = int_to_ptr.vmem [resolvable:$true] %s156_s25 }
  0x1d   :  { %186 = vmatprep.subr.mxu0 %v296_v0  ;;  %v55_v9 = vld [vmem:[#allocation5 + $0x38] sm:$0xff]  ;;  %v54_v10 = vld [vmem:[#allocation5 + $0x30] sm:$0xff]  ;;  %v53_v11 = vld [vmem:[#allocation5 + $0x28] sm:$0xff]  ;;  %s266_s26 = scalar_lea.vmem %s157_s25, 128  ;;  %p271_p11 = scmp.lt.s32.totalorder %s157_s25, %s157_s25 }
  0x1e   :  { %187 = vmatpush3.msra.mxu0 %v62_v2  ;;  %v52_v12 = vld [vmem:[#allocation5 + $0x20] sm:$0xff]  ;;  %v51_v13 = vld [vmem:[#allocation5 + $0x18] sm:$0xff]  ;;  %v50_v14 = vld [vmem:[#allocation5 + $0x10] sm:$0xff]  ;;  %p267_p10 = scmp.ne.s32.totalorder %s157_s25, %s266_s26  ;;  %p272_p12 = scmp.lt.s32.totalorder %s266_s26, %s266_s26 }
  0x1f   :  { %188 = vmatprep.subr.mxu0 %v296_v0  ;;  %v49_v15 = vld [vmem:[#allocation5 + $0x8] sm:$0xff]  ;;  %v48_v16 = vld [vmem:[#allocation5] sm:$0xff]  ;;  %v47_v17 = vld [vmem:[#allocation2] sm:$0xff] }
  0x20   :  { %189 = vmatpush3.msra.mxu0 %v61_v3  ;;  %v166_v19 = vld [vmem:[%s333_s2] ss:$0 sm:$0xff]  ;;  %p273_p13 = por %p272_p12, %p271_p11 }
  0x21   :  { %190 = vmatprep.subr.mxu0 %v296_v0 }
  0x22   :  { %191 = vmatpush3.msra.mxu0 %v60_v4  ;;  %p274_p0 = pnand %p273_p13, %p267_p10 }
  0x23   :  { %192 = vmatprep.subr.mxu0 %v296_v0 }
  0x24   :  { %193 = vmatpush3.msra.mxu0 %v59_v5 }
  0x25   :  { %194 = vmatprep.subr.mxu0 %v296_v0 }
  0x26   :  { %195 = vmatpush3.msra.mxu0 %v58_v6 }
  0x27   :  { %196 = vmatprep.subr.mxu0 %v296_v0 }
  0x28   :  { %197 = vmatpush3.msra.mxu0 %v57_v7 }
  0x29   :  { %198 = vmatprep.subr.mxu0 %v296_v0 }
  0x2a   :  { %199 = vmatpush3.msra.mxu0 %v56_v8 }
  0x2b   :  { %200 = vmatprep.subr.mxu0 %v296_v0 }
  0x2c   :  { %201 = vmatpush3.msra.mxu0 %v55_v9 }
  0x2d   :  { %202 = vmatprep.subr.mxu0 %v296_v0 }
  0x2e   :  { %203 = vmatpush3.msra.mxu0 %v54_v10 }
  0x2f   :  { %204 = vmatprep.subr.mxu0 %v296_v0 }
  0x30   :  { %205 = vmatpush3.msra.mxu0 %v53_v11 }
  0x31   :  { %206 = vmatprep.subr.mxu0 %v296_v0 }
  0x32   :  { %207 = vmatpush3.msra.mxu0 %v52_v12 }
  0x33   :  { %208 = vmatprep.subr.mxu0 %v296_v0 }
  0x34   :  { %209 = vmatpush3.msra.mxu0 %v51_v13 }
  0x35   :  { %210 = vmatprep.subr.mxu0 %v296_v0 }
  0x36   :  { %211 = vmatpush3.msra.mxu0 %v50_v14 }
  0x37   :  { %212 = vmatprep.subr.mxu0 %v296_v0 }
  0x38   :  { %213 = vmatpush3.msra.mxu0 %v49_v15 }
  0x39   :  { %214 = vmatprep.subr.mxu0 %v296_v0 }
  0x3a   :  { %215 = vmatpush3.msra.mxu0 %v48_v16 }
  0x3b   :  { %217 = vmatmul.mubr.f32.vlgmr.msra.gmra.mxu0 %v47_v17 }
  0xfb   :  { %v130_v18 = vpop.f32.mrf.mxu0 }
  0xfc   :  { %v147_v21 = vadd.f32 %v166_v19, %v130_v18 }
  0xfd   :  { %v218_v20 = vpop.f32.mrf.mxu0 }
  0xfe   :  { %v148_v22 = vmax.f32 %v147_v21, 0.0 }
 0x100   :  { %149 = vst [vmem:[#allocation7] sm:$0xff] %v148_v22 }
 0x101   :  { %277 = shalt.err (!%p274_p0)
}
 0x102   :  { %159 = dma.vmem_to_hbm [thread:$0]  %s157_s25, 128, %s334_s3, [#allocation4]  }
 0x103   :  { %290 = dma.done.wait [#allocation4], 128  }
 0x104   :  { %291 = vsyncadd [#allocation4], 4294967168 }
 0x105   :  { %163 = vsyncpa [#allocation3], 1 }
 0x106   :  { %164 = vsyncpa [#allocation6], 1 }
 0x107   :  { %165 = vsyncpa [#allocation4], 1 }

</bundles_post_ra>
